<compile_context>
chip_gen: v6e
topology: v6e:2x2x1
jax: 0.10.0
libtpu: 0.0.40
codegen_flags: <defaults>
</compile_context>

<pallas_src>
import jax
import jax.numpy as jnp
from jax import lax
from jax.experimental import pallas as pl
from jax.experimental.pallas import tpu as pltpu


# Column indices inside the packed (N, 4) parameter slab.
_WB, _BB, _WO, _DIAG = 0, 1, 2, 3


def _sigmoid(z):
    # Single-EUP lowering (one tanh); equals sigmoid to ~1 ulp and keeps the
    # elementwise path off a VALU divide (v5e has one EUP, no f32 spare).
    return 0.5 * (jnp.tanh(0.5 * z) + 1.0)


def _utility_kernel_diag(p_ref, xt_ref, o_ref):
    # p_ref : (N, 4)  packed [w_bias | b_bias | w_out | diag(w_eta)] columns
    # xt_ref: (1, tm) batch tile, batch on lanes
    # o_ref : (1, tm) lane-dense output tile
    xt = xt_ref[...]
    # bias_layer: Linear(1, N) is rank-1 -> VPU broadcast FMA.
    h1 = p_ref[:, _WB:_WB + 1] * xt + p_ref[:, _BB:_BB + 1]          # (N, tm)
    # etas_layer is diagonal after normalize() -> pure VPU multiply.
    h2 = _sigmoid(p_ref[:, _DIAG:_DIAG + 1] * h1)                    # (N, tm)
    # output: Linear(N, 1) -> XLU sublane reduce, lane-dense store.
    o_ref[...] = jnp.sum(h2 * p_ref[:, _WO:_WO + 1], axis=0,
                         keepdims=True).astype(o_ref.dtype)


def _utility_kernel_dense(p_ref, we_ref, xt_ref, o_ref):
    # Fallback for arbitrary (non-diagonal) etas_layer weights.
    xt = xt_ref[...]
    h1 = p_ref[:, _WB:_WB + 1] * xt + p_ref[:, _BB:_BB + 1]          # (N, tm)
    # Contract w_eta's axis 1 == (h1^T @ w_eta^T)^T: MXU, natural (N,N) layout,
    # f32 operands/accumulation (Mosaic multi-pass emulation).
    z = lax.dot_general(we_ref[...], h1,
                        dimension_numbers=(((1,), (0,)), ((), ())),
                        preferred_element_type=jnp.float32)          # (N, tm)
    h2 = _sigmoid(z)
    o_ref[...] = jnp.sum(h2 * p_ref[:, _WO:_WO + 1], axis=0,
                         keepdims=True).astype(o_ref.dtype)


def utility_increasing_forward(x, w_bias, b_bias, w_eta, w_out, *,
                               diagonal_eta=False, max_tile=2048,
                               core_parallel=False):
    """x: (B, 1). w_bias: (N, 1). b_bias: (N,). w_eta: (N, N). w_out: (1, N).

    diagonal_eta=True is only valid when w_eta is diagonal (i.e. normalize()
    has been applied); the caller is responsible for that invariant.
    """
    B = x.shape[0]
    N = b_bias.shape[0]

    # Batch tile: as large as allowed (amortizes per-step overhead, fills the
    # MXU / DMA); must be a multiple of 128 unless it covers the whole batch.
    if B <= 128:
        tm = B
    else:
        tile_cap = max(128, (max_tile // 128) * 128)
        tm = min(tile_cap, (B // 128) * 128)
    grid = (pl.cdiv(B, tm),)   # ragged tail handled by Pallas edge blocks

    # Glue (reshapes / stacking only — no transposed copies of w_eta).
    xt = x.astype(jnp.float32).reshape(1, B)
    diag_col = (jnp.diagonal(w_eta).astype(jnp.float32) if diagonal_eta
                else jnp.zeros((N,), jnp.float32))
    packed = jnp.stack(
        [w_bias.astype(jnp.float32).reshape(N),
         b_bias.astype(jnp.float32).reshape(N),
         w_out.astype(jnp.float32).reshape(N),
         diag_col], axis=1)                                          # (N, 4)

    p_spec = pl.BlockSpec((N, 4), lambda i: (0, 0))
    x_spec = pl.BlockSpec((1, tm), lambda i: (0, i))
    o_spec = pl.BlockSpec((1, tm), lambda i: (0, i))

    # "parallel" vs "arbitrary" is ~neutral; CORE_PARALLEL explicitly shards
    # batch tiles across the 2 TensorCores on v7x (opt-in for portability).
    dim_sem = (pltpu.CORE_PARALLEL,) if core_parallel else ("parallel",)
    cparams = pltpu.CompilerParams(dimension_semantics=dim_sem)

    if diagonal_eta:
        cost = pl.CostEstimate(flops=9 * N * B,
                               transcendentals=N * B,
                               bytes_accessed=4 * (2 * B + 4 * N))
        out = pl.pallas_call(
            _utility_kernel_diag,
            out_shape=jax.ShapeDtypeStruct((1, B), jnp.float32),
            grid=grid,
            in_specs=[p_spec, x_spec],
            out_specs=o_spec,
            compiler_params=cparams,
            cost_estimate=cost,
        )(packed, xt)
    else:
        we = w_eta.astype(jnp.float32)                               # (N, N)
        cost = pl.CostEstimate(flops=2 * N * N * B + 9 * N * B,
                               transcendentals=N * B,
                               bytes_accessed=4 * (2 * B + N * N + 4 * N))
        out = pl.pallas_call(
            _utility_kernel_dense,
            out_shape=jax.ShapeDtypeStruct((1, B), jnp.float32),
            grid=grid,
            in_specs=[p_spec,
                      pl.BlockSpec((N, N), lambda i: (0, 0)),
                      x_spec],
            out_specs=o_spec,
            compiler_params=cparams,
            cost_estimate=cost,
        )(packed, we, xt)

    return out.reshape(B, 1)


def init_params(key, nb_prim):
    """Deterministic re-creation of Utility_Increasing.__init__ (+ normalize)."""
    k_bias, k_eta = jax.random.split(key)
    w_bias = jnp.ones((nb_prim, 1), jnp.float32)                  # frozen ones
    b_bias = -jax.random.uniform(k_bias, (nb_prim,), jnp.float32)
    w_eta = jax.random.uniform(k_eta, (nb_prim, nb_prim), jnp.float32) * nb_prim
    w_out = jnp.ones((1, nb_prim), jnp.float32)

    # normalize() semantics (parameter-setup glue, not the hot path):
    w_eta = jnp.clip(w_eta, 0.0, None) * jnp.eye(nb_prim, dtype=jnp.float32)
    w_out = jnp.where(b_bias[None, :] > 0.0, 0.0, w_out)
    w_out = jnp.where(b_bias[None, :] < -1.0, -1.0, w_out)
    w_out = jnp.clip(w_out, 0.0, None)
    w_out = w_out / jnp.sum(w_out)
    b_bias = jnp.clip(b_bias, -1.0, 0.0)
    return w_bias, b_bias, w_eta, w_out


def reference_forward(x, w_bias, b_bias, w_eta, w_out):
    # Rank-1 bias layer written elementwise (exact); f32 matmuls at HIGHEST
    # precision so the comparison is apples-to-apples with the f32 kernel.
    h1 = x * w_bias.reshape(1, -1) + b_bias[None, :]
    z = jnp.dot(h1, w_eta.T, precision=lax.Precision.HIGHEST)
    h2 = jax.nn.sigmoid(z)
    return jnp.dot(h2, w_out.T, precision=lax.Precision.HIGHEST)


if __name__ == "__main__":
    NB_PRIM = 128   # number of sigmoid primitives (lane-aligned)

    key = jax.random.PRNGKey(0)
    k_params, k_x1, k_x2 = jax.random.split(key, 3)
    w_bias, b_bias, w_eta, w_out = init_params(k_params, NB_PRIM)

    # The diagonal fast path is only used when w_eta really is diagonal
    # (guaranteed after normalize(); checked here on concrete weights).
    diag_ok = bool(jnp.all(w_eta == jnp.diag(jnp.diagonal(w_eta))))

    # (key, batch, max_tile): single small block; multi-block ragged grid;
    # single larger ragged block.
    cases = [(k_x1, 8, 2048), (k_x2, 300, 128), (k_x2, 300, 2048)]
    for k_x, batch, max_tile in cases:
        x = jax.random.uniform(k_x, (batch, 1), jnp.float32)  # utilities on [0, 1]
        y_ref = reference_forward(x, w_bias, b_bias, w_eta, w_out)
        paths = (True, False) if diag_ok else (False,)
        for use_diag in paths:
            y = jax.block_until_ready(
                utility_increasing_forward(x, w_bias, b_bias, w_eta, w_out,
                                           diagonal_eta=use_diag,
                                           max_tile=max_tile))
            assert y.shape == (batch, 1)
            assert jnp.allclose(y, y_ref, atol=1e-4, rtol=1e-4), \
                (batch, max_tile, use_diag)
    print("KERNEL_OK")
</pallas_src>

<mosaic_0001>
module attributes {stable_mosaic.version = 11 : i64} {
  func.func @_utility_kernel_diag(%arg0: i32, %arg1: memref<128x4xf32, #tpu.memory_space<vmem>>, %arg2: memref<1x8xf32, #tpu.memory_space<vmem>>, %arg3: memref<1x8xf32, #tpu.memory_space<vmem>>) attributes {dimension_semantics = [#tpu.dimension_semantics<parallel>], iteration_bounds = array<i64: 1>, scalar_prefetch = 0 : i64, scratch_operands = 0 : i64, tpu.core_type = #tpu.core_type<tc>, window_params = [{pipeline_mode = #tpu.pipeline_mode<synchronous>, transform_indices = @transform_0, window_bounds = array<i64: 128, 4>}, {transform_indices = @transform_1, window_bounds = array<i64: 1, 8>}, {transform_indices = @transform_2, window_bounds = array<i64: 1, 8>}]} {
    %c0 = arith.constant 0 : index
    %c0_0 = arith.constant 0 : index
    %0 = vector.load %arg2[%c0, %c0_0] : memref<1x8xf32, #tpu.memory_space<vmem>>, vector<1x8xf32>
    %c0_1 = arith.constant 0 : index
    %c0_2 = arith.constant 0 : index
    %1 = vector.load %arg1[%c0_1, %c0_2] : memref<128x4xf32, #tpu.memory_space<vmem>>, vector<128x1xf32>
    %2 = vector.broadcast %1 : vector<128x1xf32> to vector<128x8xf32>
    %3 = vector.broadcast %0 : vector<1x8xf32> to vector<128x8xf32>
    %4 = arith.mulf %2, %3 : vector<128x8xf32>
    %c0_3 = arith.constant 0 : index
    %c1 = arith.constant 1 : index
    %5 = vector.load %arg1[%c0_3, %c1] : memref<128x4xf32, #tpu.memory_space<vmem>>, vector<128x1xf32>
    %6 = vector.broadcast %5 : vector<128x1xf32> to vector<128x8xf32>
    %7 = arith.addf %4, %6 : vector<128x8xf32>
    %c0_4 = arith.constant 0 : index
    %c3 = arith.constant 3 : index
    %8 = vector.load %arg1[%c0_4, %c3] : memref<128x4xf32, #tpu.memory_space<vmem>>, vector<128x1xf32>
    %9 = vector.broadcast %8 : vector<128x1xf32> to vector<128x8xf32>
    %10 = arith.mulf %9, %7 : vector<128x8xf32>
    %cst = arith.constant 5.000000e-01 : f32
    %11 = vector.broadcast %cst : f32 to vector<128x8xf32>
    %12 = arith.mulf %11, %10 : vector<128x8xf32>
    %13 = math.tanh %12 : vector<128x8xf32>
    %cst_5 = arith.constant 1.000000e+00 : f32
    %14 = vector.broadcast %cst_5 : f32 to vector<128x8xf32>
    %15 = arith.addf %13, %14 : vector<128x8xf32>
    %cst_6 = arith.constant 5.000000e-01 : f32
    %16 = vector.broadcast %cst_6 : f32 to vector<128x8xf32>
    %17 = arith.mulf %16, %15 : vector<128x8xf32>
    %c0_7 = arith.constant 0 : index
    %c2 = arith.constant 2 : index
    %18 = vector.load %arg1[%c0_7, %c2] : memref<128x4xf32, #tpu.memory_space<vmem>>, vector<128x1xf32>
    %19 = vector.broadcast %18 : vector<128x1xf32> to vector<128x8xf32>
    %20 = arith.mulf %17, %19 : vector<128x8xf32>
    %cst_8 = arith.constant dense<0.000000e+00> : vector<8xf32>
    %21 = vector.multi_reduction <add>, %20, %cst_8 [0] : vector<128x8xf32> to vector<8xf32>
    %22 = vector.shape_cast %21 : vector<8xf32> to vector<1x8xf32>
    %c0_9 = arith.constant 0 : index
    %c0_10 = arith.constant 0 : index
    %23 = vector.load %arg3[%c0_9, %c0_10] : memref<1x8xf32, #tpu.memory_space<vmem>>, vector<1x8xf32>
    tpu.vector_store %arg3[%c0_9, %c0_10], %22 {strides = array<i32>} : memref<1x8xf32, #tpu.memory_space<vmem>>, vector<1x8xf32>,
    return
  }
  func.func @transform_0(%arg0: i32) -> (i32, i32) {
    %c0_i32 = arith.constant 0 : i32
    %c0_i32_0 = arith.constant 0 : i32
    %c0_i32_1 = arith.constant 0 : i32
    return %c0_i32, %c0_i32_0 : i32, i32
  }
  func.func @transform_1(%arg0: i32) -> (i32, i32) {
    %c0_i32 = arith.constant 0 : i32
    %c0_i32_0 = arith.constant 0 : i32
    return %c0_i32, %arg0 : i32, i32
  }
  func.func @transform_2(%arg0: i32) -> (i32, i32) {
    %c0_i32 = arith.constant 0 : i32
    %c0_i32_0 = arith.constant 0 : i32
    return %c0_i32, %arg0 : i32, i32
  }
}

</mosaic_0001>

<bundles_post_ra>
// kernel: tpu_custom_call.1
= control target key start
LH: loop header
LB: loop body
LE: loop exit
PB: predicated region body
PF: predicated region fallthrough
CT: control target
= control target key end

     0   :  { %v562_v2 = vmov 0   ;;  %s799_s0 = inlined_call_operand.vmem [shape: f32[128,4], index: 0, kind: input, shape index: {}]   ;;  %s800_s1 = inlined_call_operand.vmem [shape: f32[1,8], index: 1, kind: input, shape index: {}]   ;;  %s801_s2 = inlined_call_operand.hbm [shape: f32[1,8], index: 2, kind: output, shape index: {}]  }
   0x1   :  { %v585_v0 = vld [vmem:[%s799_s0 + $0x10] sm:$0xff]  ;;  %v590_v1 = vld [vmem:[%s799_s0] sm:$0xff]  ;;  %496 = vset.pattern.permute.xlu1 %v562_v2  ;;  %495 = vset.pattern.permute.xlu0 %v562_v2  ;;  %v597_v3 = vld [vmem:[%s799_s0 + $0x18] sm:$0xff] }
   0x2   :  { %41 = vperm.xlu1 %496, %v585_v0   ;;  %31 = vperm.xlu0 %495, %v590_v1   ;;  %v14_v4 = vld [vmem:[%s799_s0 + $0x8] sm:$0xff] }
   0x3   :  { %7 = vsyncpa [#allocation3], 0  ;;  %v606_v5 = vld [vmem:[%s799_s0 + $0x28] sm:$0xff]  ;;  %v611_v6 = vld [vmem:[%s799_s0 + $0x20] sm:$0xff]  ;;  %v563_v17 = vmov 1   ;;  %v564_v18 = vmov 3  }
   0x4   :  { %v618_v7 = vld [vmem:[%s799_s0 + $0x38] sm:$0xff]  ;;  %v623_v8 = vld [vmem:[%s799_s0 + $0x30] sm:$0xff]  ;;  %v630_v9 = vld [vmem:[%s799_s0 + $0x48] sm:$0xff]  ;;  %v565_v19 = vmov 2   ;;  %vm435_vm0 = vcmask 64512   ;;  %vm473_vm1 = vcmask 57344  }
   0x5   :  { %v635_v10 = vld [vmem:[%s799_s0 + $0x40] sm:$0xff]  ;;  %v24_v11 = vld [vmem:[%s799_s0 + $0x58] sm:$0xff]  ;;  %v645_v12 = vld [vmem:[%s799_s0 + $0x50] sm:$0xff] }
   0x6   :  { %46 = vperm.xlu1 %496, %v597_v3   ;;  %36 = vperm.xlu0 %495, %v14_v4   ;;  %v26_v13 = vld [vmem:[%s799_s0 + $0x68] sm:$0xff]  ;;  %v654_v14 = vld [vmem:[%s799_s0 + $0x60] sm:$0xff]  ;;  %v28_v15 = vld [vmem:[%s799_s0 + $0x78] sm:$0xff] }
   0x7   :  { %v663_v16 = vld [vmem:[%s799_s0 + $0x70] sm:$0xff]  ;;  %v741_v52 = vld [vmem:[%s800_s1] ss:$0 sm:$0xff]  ;;  %s566_s1 = smov [#allocation2]  }
   0x8   :  { %s481_s14 = sshll.u32 %s566_s1, 4  ;;  %s482_s14 = int_to_ptr.vmem [resolvable:$true] %s481_s14 }
   0x9   :  { %s540_s15 = scalar_lea.vmem %s482_s14, 16  ;;  %s544_s16 = scalar_lea.vmem %s482_s14, 32 }
   0xa   :  { %56 = vperm.xlu1 %496, %v606_v5   ;;  %51 = vperm.xlu0 %495, %v611_v6   ;;  %p541_p0 = scmp.ne.s32.totalorder %s482_s14, %s540_s15  ;;  %p545_p1 = scmp.lt.s32.totalorder %s482_s14, %s482_s14 }
   0xb   :  { %p546_p2 = scmp.lt.s32.totalorder %s544_s16, %s540_s15 }
   0xd   :  { %p547_p3 = por %p546_p2, %p545_p1 }
   0xe   :  { %66 = vperm.xlu1 %496, %v618_v7   ;;  %61 = vperm.xlu0 %495, %v623_v8  }
   0xf   :  { %p548_p4 = pnand %p547_p3, %p541_p0 }
  0x12   :  { %76 = vperm.xlu1 %496, %v630_v9   ;;  %71 = vperm.xlu0 %495, %v635_v10  }
  0x16   :  { %86 = vperm.xlu1 %496, %v24_v11   ;;  %81 = vperm.xlu0 %495, %v645_v12  }
  0x1a   :  { %96 = vperm.xlu1 %496, %v26_v13   ;;  %91 = vperm.xlu0 %495, %v654_v14  }
  0x1e   :  { %106 = vperm.xlu1 %496, %v28_v15   ;;  %101 = vperm.xlu0 %495, %v663_v16  }
  0x22   :  { %498 = vset.pattern.permute.xlu1 %v563_v17  ;;  %497 = vset.pattern.permute.xlu0 %v563_v17 }
  0x23   :  { %136 = vperm.xlu1 %498, %v14_v4   ;;  %132 = vperm.xlu0 %497, %v590_v1  }
  0x27   :  { %140 = vperm.xlu1 %498, %v585_v0   ;;  %144 = vperm.xlu0 %497, %v597_v3  }
  0x2b   :  { %148 = vperm.xlu1 %498, %v611_v6   ;;  %152 = vperm.xlu0 %497, %v606_v5  }
  0x2f   :  { %156 = vperm.xlu1 %498, %v623_v8   ;;  %160 = vperm.xlu0 %497, %v618_v7  }
  0x33   :  { %164 = vperm.xlu1 %498, %v635_v10   ;;  %168 = vperm.xlu0 %497, %v630_v9  }
  0x37   :  { %172 = vperm.xlu1 %498, %v645_v12   ;;  %176 = vperm.xlu0 %497, %v24_v11  }
  0x3b   :  { %180 = vperm.xlu1 %498, %v654_v14   ;;  %184 = vperm.xlu0 %497, %v26_v13  }
  0x3f   :  { %188 = vperm.xlu1 %498, %v663_v16   ;;  %192 = vperm.xlu0 %497, %v28_v15  }
  0x43   :  { %499 = vset.pattern.permute.xlu1 %v564_v18  ;;  %501 = vset.pattern.permute.xlu0 %v565_v19 }
  0x44   :  { %212 = vperm.xlu1 %499, %v590_v1   ;;  %360 = vperm.xlu0 %501, %v14_v4  }
  0x48   :  { %220 = vperm.xlu1 %499, %v585_v0   ;;  %502 = vset.pattern.permute.xlu0 %v564_v18 }
  0x49   :  { %216 = vperm.xlu0 %502, %v14_v4  }
  0x4c   :  { %224 = vperm.xlu1 %499, %v597_v3  }
  0x4d   :  { %228 = vperm.xlu0 %502, %v611_v6  }
  0x50   :  { %232 = vperm.xlu1 %499, %v606_v5  }
  0x51   :  { %236 = vperm.xlu0 %502, %v623_v8  }
  0x54   :  { %240 = vperm.xlu1 %499, %v618_v7  }
  0x55   :  { %244 = vperm.xlu0 %502, %v635_v10  }
  0x58   :  { %248 = vperm.xlu1 %499, %v630_v9  }
  0x59   :  { %252 = vperm.xlu0 %502, %v645_v12  }
  0x5c   :  { %256 = vperm.xlu1 %499, %v24_v11  }
  0x5d   :  { %260 = vperm.xlu0 %502, %v654_v14  }
  0x60   :  { %500 = vset.pattern.permute.xlu1 %v565_v19 }
  0x61   :  { %356 = vperm.xlu1 %500, %v590_v1   ;;  %268 = vperm.xlu0 %502, %v663_v16  }
  0x65   :  { %503 = vset.pattern.permute.xlu1 %v564_v18  ;;  %506 = vset.pattern.permute.xlu0 %v565_v19 }
  0x66   :  { %264 = vperm.xlu1 %503, %v26_v13   ;;  %372 = vperm.xlu0 %506, %v611_v6  }
  0x6a   :  { %504 = vset.pattern.permute.xlu1 %v565_v19  ;;  %384 = vperm.xlu0 %506, %v618_v7  }
  0x6b   :  { %364 = vperm.xlu1 %504, %v585_v0  }
  0x6e   :  { %392 = vperm.xlu0 %506, %v630_v9  }
  0x6f   :  { %368 = vperm.xlu1 %504, %v597_v3  }
  0x72   :  { %400 = vperm.xlu0 %506, %v24_v11  }
  0x73   :  { %505 = vset.pattern.permute.xlu1 %v564_v18 }
  0x74   :  { %272 = vperm.xlu1 %505, %v28_v15  }
  0x76   :  { %408 = vperm.xlu0 %506, %v26_v13  }
  0x78   :  { %507 = vset.pattern.permute.xlu1 %v565_v19 }
  0x79   :  { %376 = vperm.xlu1 %507, %v606_v5  }
  0x7a   :  { %416 = vperm.xlu0 %506, %v28_v15  }
  0x7d   :  { %v42_v20 = vpop.permute.xlu1 %41  ;;  %380 = vperm.xlu1 %507, %v623_v8   ;;  %v32_v21 = vpop.permute.xlu0 %31 }
  0x7e   :  { %v115_v53 = vmul.f32 %v741_v52, %v32_v21  ;;  %v117_v61 = vmul.f32 %v741_v52, %v42_v20 }
  0x81   :  { %v47_v22 = vpop.permute.xlu1 %46  ;;  %388 = vperm.xlu1 %507, %v635_v10   ;;  %v37_v23 = vpop.permute.xlu0 %36 }
  0x82   :  { %v116_v57 = vmul.f32 %v741_v52, %v37_v23  ;;  %v118_v6 = vmul.f32 %v741_v52, %v47_v22 }
  0x85   :  { %v699_v24 = vpop.permute.xlu1 %56  ;;  %396 = vperm.xlu1 %507, %v645_v12   ;;  %v52_v25 = vpop.permute.xlu0 %51 }
  0x86   :  { %v119_v12 = vmul.f32 %v741_v52, %v52_v25  ;;  %v120_v17 = vmul.f32 %v741_v52, %v699_v24 }
  0x89   :  { %v702_v26 = vpop.permute.xlu1 %66  ;;  %404 = vperm.xlu1 %507, %v654_v14   ;;  %v705_v27 = vpop.permute.xlu0 %61 }
  0x8a   :  { %v122_v20 = vmul.f32 %v741_v52, %v702_v26  ;;  %v121_v22 = vmul.f32 %v741_v52, %v705_v27 }
  0x8d   :  { %v707_v28 = vpop.permute.xlu1 %76  ;;  %412 = vperm.xlu1 %507, %v663_v16   ;;  %v710_v29 = vpop.permute.xlu0 %71 }
  0x8e   :  { %v123_v26 = vmul.f32 %v741_v52, %v710_v29 }
  0x91   :  { %v712_v30 = vpop.permute.xlu1 %86  ;;  %v714_v31 = vpop.permute.xlu0 %81 }
  0x95   :  { %v716_v32 = vpop.permute.xlu1 %96  ;;  %v718_v33 = vpop.permute.xlu0 %91 }
  0x99   :  { %v720_v34 = vpop.permute.xlu1 %106  ;;  %v722_v35 = vpop.permute.xlu0 %101 }
  0x9e   :  { %v137_v36 = vpop.permute.xlu1 %136  ;;  %v133_v37 = vpop.permute.xlu0 %132 }
  0x9f   :  { %v195_v56 = vadd.f32 %v133_v37, %v115_v53  ;;  %v196_v59 = vadd.f32 %v137_v36, %v116_v57 }
  0xa2   :  { %v141_v38 = vpop.permute.xlu1 %140  ;;  %v145_v39 = vpop.permute.xlu0 %144 }
  0xa3   :  { %v197_v0 = vadd.f32 %v141_v38, %v117_v61  ;;  %v198_v7 = vadd.f32 %v145_v39, %v118_v6 }
  0xa6   :  { %v149_v40 = vpop.permute.xlu1 %148  ;;  %v153_v41 = vpop.permute.xlu0 %152 }
  0xa7   :  { %v199_v14 = vadd.f32 %v149_v40, %v119_v12  ;;  %v200_v21 = vadd.f32 %v153_v41, %v120_v17  ;;  %v124_v40 = vmul.f32 %v741_v52, %v707_v28 }
  0xaa   :  { %v157_v42 = vpop.permute.xlu1 %156  ;;  %v161_v43 = vpop.permute.xlu0 %160 }
  0xab   :  { %v202_v23 = vadd.f32 %v161_v43, %v122_v20  ;;  %v201_v24 = vadd.f32 %v157_v42, %v121_v22  ;;  %v125_v42 = vmul.f32 %v741_v52, %v714_v31 }
  0xae   :  { %v724_v44 = vpop.permute.xlu1 %164  ;;  %v169_v45 = vpop.permute.xlu0 %168 }
  0xaf   :  { %v204_v41 = vadd.f32 %v169_v45, %v124_v40  ;;  %v203_v28 = vadd.f32 %v724_v44, %v123_v26 }
  0xb2   :  { %v726_v46 = vpop.permute.xlu1 %172  ;;  %v728_v47 = vpop.permute.xlu0 %176 }
  0xb6   :  { %v730_v48 = vpop.permute.xlu1 %180  ;;  %v732_v49 = vpop.permute.xlu0 %184 }
  0xba   :  { %v734_v50 = vpop.permute.xlu1 %188  ;;  %v736_v51 = vpop.permute.xlu0 %192 }
  0xbf   :  { %v213_v54 = vpop.permute.xlu1 %212  ;;  %v744_v55 = vpop.permute.xlu0 %360 }
  0xc0   :  { %v275_v58 = vmul.f32 %v213_v54, %v195_v56 }
  0xc2   :  { %v291_v1 = vmul.f32 0.5, %v275_v58  ;;  %v126_v58 = vmul.f32 %v741_v52, %v712_v30 }
  0xc3   :  { %v221_v60 = vpop.permute.xlu1 %220 }
  0xc4   :  { %v217_v62 = vpop.permute.xlu0 %216  ;;  %v277_v4 = vmul.f32 %v221_v60, %v197_v0  ;;  %508 = vtanh.f32 %v291_v1  ;;  %v206_v29 = vadd.f32 %v728_v47, %v126_v58  ;;  %v127_v47 = vmul.f32 %v741_v52, %v718_v33 }
  0xc5   :  { %v276_v63 = vmul.f32 %v217_v62, %v196_v59  ;;  %v129_v33 = vmul.f32 %v741_v52, %v722_v35 }
  0xc6   :  { %v293_v9 = vmul.f32 0.5, %v277_v4 }
  0xc7   :  { %v292_v2 = vmul.f32 0.5, %v276_v63  ;;  %v225_v3 = vpop.permute.xlu1 %224  ;;  %v209_v20 = vadd.f32 %v734_v50, %v129_v33 }
  0xc8   :  { %v229_v5 = vpop.permute.xlu0 %228  ;;  %v278_v11 = vmul.f32 %v225_v3, %v198_v7  ;;  %v205_v3 = vadd.f32 %v726_v46, %v125_v42 }
  0xc9   :  { %510 = vtanh.f32 %v292_v2  ;;  %v279_v18 = vmul.f32 %v229_v5, %v199_v14  ;;  %v128_v5 = vmul.f32 %v741_v52, %v716_v32 }
  0xca   :  { %512 = vtanh.f32 %v293_v9  ;;  %v294_v15 = vmul.f32 0.5, %v278_v11  ;;  %v207_v11 = vadd.f32 %v730_v48, %v127_v47 }
  0xcb   :  { %v233_v8 = vpop.permute.xlu1 %232  ;;  %v295_v36 = vmul.f32 0.5, %v279_v18  ;;  %v208_v9 = vadd.f32 %v732_v49, %v128_v5 }
  0xcc   :  { %v237_v10 = vpop.permute.xlu0 %236  ;;  %514 = vtanh.f32 %v294_v15  ;;  %v280_v37 = vmul.f32 %v233_v8, %v200_v21 }
  0xcd   :  { %v281_v56 = vmul.f32 %v237_v10, %v201_v24  ;;  %516 = vtanh.f32 %v295_v36 }
  0xce   :  { %v296_v27 = vmul.f32 0.5, %v280_v37 }
  0xcf   :  { %v241_v13 = vpop.permute.xlu1 %240  ;;  %v297_v45 = vmul.f32 0.5, %v281_v56 }
  0xd0   :  { %v245_v16 = vpop.permute.xlu0 %244  ;;  %v282_v53 = vmul.f32 %v241_v13, %v202_v23  ;;  %518 = vtanh.f32 %v296_v27 }
  0xd1   :  { %v509_v25 = vpop.eup %508  ;;  %v283_v1 = vmul.f32 %v245_v16, %v203_v28 }
  0xd2   :  { %v323_v43 = vadd.f32 1.0, %v509_v25  ;;  %v298_v59 = vmul.f32 0.5, %v282_v53 }
  0xd3   :  { %v249_v19 = vpop.permute.xlu1 %248  ;;  %v299_v10 = vmul.f32 0.5, %v283_v1 }
  0xd4   :  { %v253_v54 = vpop.permute.xlu0 %252  ;;  %v284_v60 = vmul.f32 %v249_v19, %v204_v41  ;;  %v339_v2 = vmul.f32 0.5, %v323_v43  ;;  %520 = vtanh.f32 %v298_v59 }
  0xd5   :  { %v285_v8 = vmul.f32 %v253_v54, %v205_v3  ;;  %522 = vtanh.f32 %v297_v45  ;;  %v130_v54 = vmul.f32 %v741_v52, %v720_v34 }
  0xd6   :  { %v511_v39 = vpop.eup %510  ;;  %v300_v30 = vmul.f32 0.5, %v284_v60 }
  0xd7   :  { %v257_v38 = vpop.permute.xlu1 %256  ;;  %v324_v57 = vadd.f32 1.0, %v511_v39  ;;  %v513_v62 = vpop.eup %512  ;;  %v301_v17 = vmul.f32 0.5, %v285_v8  ;;  %v210_v41 = vadd.f32 %v736_v51, %v130_v54 }
  0xd8   :  { %v261_v63 = vpop.permute.xlu0 %260  ;;  %v325_v4 = vadd.f32 1.0, %v513_v62  ;;  %v286_v44 = vmul.f32 %v257_v38, %v206_v29  ;;  %524 = vtanh.f32 %v300_v30 }
  0xd9   :  { %v340_v0 = vmul.f32 0.5, %v324_v57  ;;  %v515_v31 = vpop.eup %514  ;;  %526 = vtanh.f32 %v299_v10  ;;  %v287_v18 = vmul.f32 %v261_v63, %v207_v11 }
  0xda   :  { %v341_v32 = vmul.f32 0.5, %v325_v4  ;;  %v302_v13 = vmul.f32 0.5, %v286_v44  ;;  %v326_v16 = vadd.f32 1.0, %v515_v31  ;;  %v517_v48 = vpop.eup %516 }
  0xdb   :  { %v420_v46 = vmul.f32 %v744_v55, %v340_v0  ;;  %v303_v38 = vmul.f32 0.5, %v287_v18  ;;  %v327_v40 = vadd.f32 1.0, %v517_v48 }
  0xdc   :  { %v357_v61 = vpop.permute.xlu1 %356  ;;  %v269_v12 = vpop.permute.xlu0 %268  ;;  %528 = vtanh.f32 %v302_v13  ;;  %v342_v25 = vmul.f32 0.5, %v326_v16 }
  0xdd   :  { %v419_v6 = vmul.f32 %v357_v61, %v339_v2  ;;  %v437_v55 = vsel %vm435_vm0, %v420_v46, 0.0  ;;  %530 = vtanh.f32 %v301_v17  ;;  %v289_v39 = vmul.f32 %v269_v12, %v209_v20  ;;  %v519_v53 = vpop.eup %518 }
  0xde   :  { %v343_v27 = vmul.f32 0.5, %v327_v40  ;;  %v328_v58 = vadd.f32 1.0, %v519_v53 }
  0xdf   :  { %v436_v14 = vsel %vm435_vm0, %v419_v6, 0.0  ;;  %v305_v57 = vmul.f32 0.5, %v289_v39 }
  0xe0   :  { %v438_v21 = vadd.f32 %v437_v55, %v436_v14  ;;  %v344_v34 = vmul.f32 0.5, %v328_v58 }
  0xe1   :  { %v265_v7 = vpop.permute.xlu1 %264  ;;  %v373_v36 = vpop.permute.xlu0 %372 }
  0xe2   :  { %v288_v15 = vmul.f32 %v265_v7, %v208_v9  ;;  %v521_v26 = vpop.eup %520  ;;  %v423_v42 = vmul.f32 %v373_v36, %v343_v27 }
  0xe3   :  { %v523_v59 = vpop.eup %522  ;;  %v330_v61 = vadd.f32 1.0, %v521_v26 }
  0xe4   :  { %v304_v22 = vmul.f32 0.5, %v288_v15  ;;  %v329_v52 = vadd.f32 1.0, %v523_v59  ;;  %v443_v0 = vsel %vm435_vm0, %v423_v42, 0.0 }
  0xe5   :  { %v385_v60 = vpop.permute.xlu0 %384  ;;  %v525_v28 = vpop.eup %524  ;;  %v346_v63 = vmul.f32 0.5, %v330_v61 }
  0xe6   :  { %v365_v49 = vpop.permute.xlu1 %364  ;;  %532 = vtanh.f32 %v304_v22  ;;  %v527_v45 = vpop.eup %526  ;;  %v332_v1 = vadd.f32 1.0, %v525_v28  ;;  %v345_v6 = vmul.f32 0.5, %v329_v52 }
  0xe7   :  { %v421_v19 = vmul.f32 %v365_v49, %v341_v32  ;;  %534 = vtanh.f32 %v303_v38  ;;  %v331_v7 = vadd.f32 1.0, %v527_v45  ;;  %v426_v31 = vmul.f32 %v385_v60, %v346_v63 }
  0xe8   :  { %536 = vtanh.f32 %v305_v57  ;;  %v348_v9 = vmul.f32 0.5, %v332_v1 }
  0xe9   :  { %v439_v23 = vsel %vm435_vm0, %v421_v19, 0.0  ;;  %v529_v3 = vpop.eup %528  ;;  %v393_v30 = vpop.permute.xlu0 %392  ;;  %v347_v32 = vmul.f32 0.5, %v331_v7  ;;  %v449_v15 = vsel %vm435_vm0, %v426_v31, 0.0 }
  0xea   :  { %v440_v37 = vadd.f32 %v439_v23, %v438_v21  ;;  %v369_v35 = vpop.permute.xlu1 %368  ;;  %v531_v5 = vpop.eup %530  ;;  %v334_v10 = vadd.f32 1.0, %v529_v3  ;;  %v428_v49 = vmul.f32 %v393_v30, %v348_v9 }
  0xeb   :  { %v422_v24 = vmul.f32 %v369_v35, %v342_v25  ;;  %v333_v13 = vadd.f32 1.0, %v531_v5 }
  0xec   :  { %v350_v18 = vmul.f32 0.5, %v334_v10  ;;  %v453_v35 = vsel %vm435_vm0, %v428_v49, 0.0 }
  0xed   :  { %v441_v50 = vsel %vm435_vm0, %v422_v24, 0.0  ;;  %v401_v16 = vpop.permute.xlu0 %400  ;;  %v349_v21 = vmul.f32 0.5, %v333_v13 }
  0xee   :  { %v442_v56 = vadd.f32 %v441_v50, %v440_v37  ;;  %v430_v38 = vmul.f32 %v401_v16, %v350_v18 }
  0xef   :  { %v273_v43 = vpop.permute.xlu1 %272 }
  0xf0   :  { %v290_v62 = vmul.f32 %v273_v43, %v210_v41  ;;  %v444_v4 = vadd.f32 %v443_v0, %v442_v56  ;;  %v457_v27 = vsel %vm435_vm0, %v430_v38, 0.0 }
  0xf1   :  { %v409_v24 = vpop.permute.xlu0 %408 }
  0xf2   :  { %v306_v29 = vmul.f32 0.5, %v290_v62 }
  0xf3   :  { %v533_v11 = vpop.eup %532 }
  0xf4   :  { %538 = vtanh.f32 %v306_v29  ;;  %v377_v51 = vpop.permute.xlu1 %376  ;;  %v535_v14 = vpop.eup %534  ;;  %v336_v55 = vadd.f32 1.0, %v533_v11 }
  0xf5   :  { %v424_v2 = vmul.f32 %v377_v51, %v344_v34  ;;  %v335_v22 = vadd.f32 1.0, %v535_v14  ;;  %v537_v23 = vpop.eup %536  ;;  %v417_v28 = vpop.permute.xlu0 %416 }
  0xf6   :  { %v352_v39 = vmul.f32 0.5, %v336_v55  ;;  %v337_v41 = vadd.f32 1.0, %v537_v23 }
  0xf7   :  { %v445_v44 = vsel %vm435_vm0, %v424_v2, 0.0  ;;  %v351_v50 = vmul.f32 0.5, %v335_v22 }
  0xf8   :  { %v446_v47 = vadd.f32 %v445_v44, %v444_v4  ;;  %v381_v8 = vpop.permute.xlu1 %380  ;;  %v432_v43 = vmul.f32 %v409_v24, %v352_v39  ;;  %v353_v62 = vmul.f32 0.5, %v337_v41 }
  0xf9   :  { %v425_v46 = vmul.f32 %v381_v8, %v345_v6 }
  0xfa   :  { %v461_v34 = vsel %vm435_vm0, %v432_v43, 0.0 }
  0xfb   :  { %v447_v12 = vsel %vm435_vm0, %v425_v46, 0.0 }
  0xfc   :  { %v448_v33 = vadd.f32 %v447_v12, %v446_v47  ;;  %v389_v17 = vpop.permute.xlu1 %388 }
  0xfd   :  { %v427_v19 = vmul.f32 %v389_v17, %v347_v32 }
  0xfe   :  { %v450_v48 = vadd.f32 %v449_v15, %v448_v33 }
  0xff   :  { %v451_v20 = vsel %vm435_vm0, %v427_v19, 0.0 }
 0x100   :  { %v452_v25 = vadd.f32 %v451_v20, %v450_v48  ;;  %v397_v36 = vpop.permute.xlu1 %396 }
 0x101   :  { %v539_v37 = vpop.eup %538  ;;  %v429_v40 = vmul.f32 %v397_v36, %v349_v21 }
 0x102   :  { %v338_v53 = vadd.f32 1.0, %v539_v37  ;;  %v454_v54 = vadd.f32 %v453_v35, %v452_v25 }
 0x103   :  { %v455_v26 = vsel %vm435_vm0, %v429_v40, 0.0 }
 0x104   :  { %v456_v56 = vadd.f32 %v455_v26, %v454_v54  ;;  %v405_v57 = vpop.permute.xlu1 %404  ;;  %v354_v58 = vmul.f32 0.5, %v338_v53 }
 0x105   :  { %v431_v59 = vmul.f32 %v405_v57, %v351_v50 }
 0x106   :  { %v458_v60 = vadd.f32 %v457_v27, %v456_v56  ;;  %v434_v52 = vmul.f32 %v417_v28, %v354_v58 }
 0x107   :  { %v459_v61 = vsel %vm435_vm0, %v431_v59, 0.0 }
 0x108   :  { %v460_v42 = vadd.f32 %v459_v61, %v458_v60  ;;  %v413_v29 = vpop.permute.xlu1 %412  ;;  %v465_v1 = vsel %vm435_vm0, %v434_v52, 0.0 }
 0x109   :  { %v433_v45 = vmul.f32 %v413_v29, %v353_v62 }
 0x10a   :  { %v462_v63 = vadd.f32 %v461_v34, %v460_v42 }
 0x10b   :  { %v463_v51 = vsel %vm435_vm0, %v433_v45, 0.0 }
 0x10c   :  { %v464_v0 = vadd.f32 %v463_v51, %v462_v63 }
 0x10e   :  { %v466_v2 = vadd.f32 %v465_v1, %v464_v0 }
 0x110   :  { %v467_v3 = vrot.slane %v466_v2, 4 }
 0x112   :  { %v468_v30 = vadd.f32 %v467_v3, %v466_v2 }
 0x114   :  { %v469_v4 = vrot.slane %v468_v30, 2 }
 0x116   :  { %v470_v5 = vadd.f32 %v469_v4, %v468_v30 }
 0x118   :  { %v471_v44 = vrot.slane %v470_v5, 1 }
 0x11a   :  { %v472_v6 = vadd.f32 %v471_v44, %v470_v5 }
 0x11c   :  { %474 = vst.msk [vmem:[#allocation2] sm:$0x1] %vm473_vm1, %v472_v6 }
 0x11d   :  { %551 = shalt.err (!%p548_p4)
}
 0x11e   :  { %484 = dma.vmem_to_hbm [thread:$0]  %s482_s14, 16, %s801_s2, [#allocation3]  }
 0x11f   :  { %560 = dma.done.wait [#allocation3], 16  }
 0x120   :  { %561 = vsyncadd [#allocation3], 4294967280 }
 0x121   :  { %488 = vsyncpa [#allocation3], 1 }

</bundles_post_ra>
